<compile_context>
chip_gen: v5e
topology: v5e:2x2
jax: 0.10.0
libtpu: 0.0.40
codegen_flags: <defaults>
</compile_context>

<pallas_src>
import math

import jax
import jax.numpy as jnp
from jax.experimental import pallas as pl
from jax.experimental.pallas import tpu as pltpu

_TWO_PI = 2.0 * math.pi


def _gfp_kernel(x_ref, w_ref, o_ref):
    # x_ref: (tb, 1) f32, w_ref: (1, E) f32, o_ref: (tb, 2E) out_dtype
    E = w_ref.shape[-1]
    # Scale the small (tb, 1) column, not the resident (1, E) W row.
    proj = (x_ref[...] * _TWO_PI) * w_ref[...]          # (tb, E) lane broadcast
    # Direct half-writes: E is typically a multiple of 128, so both stores are
    # full unmasked lane-aligned vst streams (no concat temp).
    o_ref[:, :E] = jnp.sin(proj).astype(o_ref.dtype)
    o_ref[:, E:] = jnp.cos(proj).astype(o_ref.dtype)


def _round_up(n, m):
    return ((n + m - 1) // m) * m


def gaussian_fourier_projection(x, W, *, tb=512, out_dtype=jnp.float32):
    """x: (B,) noise levels; W: (E,) fixed Gaussian weights -> (B, 2E)."""
    (B,) = x.shape
    (E,) = W.shape

    # W is a non-trainable buffer in the PyTorch module.
    W = jax.lax.stop_gradient(W)

    # Pad the batch only up to the 8-sublane granule (cheap 1-D pad on x; for
    # B % 8 == 0 there is no pad and no output slice at all).
    Bp = _round_up(max(B, 1), 8)

    # Row tile: multiple of 8, at most `tb`, and (for B >= 16) small enough to
    # give >= 2 grid steps so the "parallel" axis shards across v7x's two TCs.
    tile = min(tb, Bp)
    if B >= 16:
        tile = min(tile, _round_up(pl.cdiv(Bp, 2), 8))
    tile = max(_round_up(tile, 8), 8)

    # VMEM budget guard (double-buffered output tile + lane-padded x column):
    # keep 2 * tile * 2E * itemsize under ~12 MiB so large E stays safe on v7x.
    out_row_bytes = 2 * E * jnp.dtype(out_dtype).itemsize
    max_rows = max(8, (((12 << 20) // (2 * out_row_bytes)) // 8) * 8)
    tile = min(tile, max_rows)

    x_col = x.astype(jnp.float32)
    if Bp != B:
        x_col = jnp.pad(x_col, (0, Bp - B))
    x_col = x_col.reshape(Bp, 1)
    w_row = W.astype(jnp.float32).reshape(1, E)

    out = pl.pallas_call(
        _gfp_kernel,
        out_shape=jax.ShapeDtypeStruct((Bp, 2 * E), out_dtype),
        grid_spec=pltpu.PrefetchScalarGridSpec(
            num_scalar_prefetch=0,
            grid=(pl.cdiv(Bp, tile),),
            in_specs=[
                pl.BlockSpec((tile, 1), lambda i: (i, 0)),   # x column tile
                pl.BlockSpec((1, E), lambda i: (0, 0)),      # resident W row
            ],
            out_specs=pl.BlockSpec((tile, 2 * E), lambda i: (i, 0)),
        ),
        compiler_params=pltpu.CompilerParams(
            dimension_semantics=("parallel",),
        ),
    )(x_col, w_row)

    if Bp != B:
        out = out[:B]
    return out


if __name__ == "__main__":
    # Small shapes consistent with the module: batch of 8 noise levels,
    # default embedding_size=256 (output last dim 512, lane aligned).
    B, E, scale = 8, 256, 1.0

    key = jax.random.PRNGKey(0)
    kx, kw = jax.random.split(key)
    x = jax.random.normal(kx, (B,), dtype=jnp.float32)
    W = jax.random.normal(kw, (E,), dtype=jnp.float32) * scale  # fixed, no grad

    out = gaussian_fourier_projection(x, W)
    out = jax.block_until_ready(out)

    # Plain-JAX reference, same semantics as the PyTorch forward.
    x_proj = x[:, None] * W[None, :] * 2.0 * math.pi
    ref = jnp.concatenate([jnp.sin(x_proj), jnp.cos(x_proj)], axis=-1)

    assert out.shape == (B, 2 * E)
    assert out.dtype == jnp.float32
    assert jnp.allclose(out, ref, atol=1e-4, rtol=1e-4)

    print("KERNEL_OK")
</pallas_src>

<mosaic_0001>
module attributes {stable_mosaic.version = 11 : i64} {
  func.func @_gfp_kernel(%arg0: i32, %arg1: memref<8x1xf32, #tpu.memory_space<vmem>>, %arg2: memref<1x256xf32, #tpu.memory_space<vmem>>, %arg3: memref<8x512xf32, #tpu.memory_space<vmem>>) attributes {dimension_semantics = [#tpu.dimension_semantics<parallel>], iteration_bounds = array<i64: 1>, scalar_prefetch = 0 : i64, scratch_operands = 0 : i64, tpu.core_type = #tpu.core_type<tc>, window_params = [{transform_indices = @transform_0, window_bounds = array<i64: 8, 1>}, {pipeline_mode = #tpu.pipeline_mode<synchronous>, transform_indices = @transform_1, window_bounds = array<i64: 1, 256>}, {transform_indices = @transform_2, window_bounds = array<i64: 8, 512>}]} {
    %c0 = arith.constant 0 : index
    %c0_0 = arith.constant 0 : index
    %0 = vector.load %arg1[%c0, %c0_0] : memref<8x1xf32, #tpu.memory_space<vmem>>, vector<8x1xf32>
    %cst = arith.constant 6.28318548 : f32
    %1 = vector.broadcast %cst : f32 to vector<8x1xf32>
    %2 = arith.mulf %0, %1 : vector<8x1xf32>
    %c0_1 = arith.constant 0 : index
    %c0_2 = arith.constant 0 : index
    %3 = vector.load %arg2[%c0_1, %c0_2] : memref<1x256xf32, #tpu.memory_space<vmem>>, vector<1x256xf32>
    %4 = vector.broadcast %2 : vector<8x1xf32> to vector<8x256xf32>
    %5 = vector.broadcast %3 : vector<1x256xf32> to vector<8x256xf32>
    %6 = arith.mulf %4, %5 : vector<8x256xf32>
    %7 = math.sin %6 : vector<8x256xf32>
    %c0_3 = arith.constant 0 : index
    %c0_4 = arith.constant 0 : index
    %8 = vector.load %arg3[%c0_3, %c0_4] : memref<8x512xf32, #tpu.memory_space<vmem>>, vector<8x256xf32>
    tpu.vector_store %arg3[%c0_3, %c0_4], %7 {strides = array<i32>} : memref<8x512xf32, #tpu.memory_space<vmem>>, vector<8x256xf32>,
    %9 = math.cos %6 : vector<8x256xf32>
    %c0_5 = arith.constant 0 : index
    %c256 = arith.constant 256 : index
    %10 = vector.load %arg3[%c0_5, %c256] : memref<8x512xf32, #tpu.memory_space<vmem>>, vector<8x256xf32>
    tpu.vector_store %arg3[%c0_5, %c256], %9 {strides = array<i32>} : memref<8x512xf32, #tpu.memory_space<vmem>>, vector<8x256xf32>,
    return
  }
  func.func @transform_0(%arg0: i32) -> (i32, i32) {
    %c0_i32 = arith.constant 0 : i32
    %c0_i32_0 = arith.constant 0 : i32
    return %arg0, %c0_i32 : i32, i32
  }
  func.func @transform_1(%arg0: i32) -> (i32, i32) {
    %c0_i32 = arith.constant 0 : i32
    %c0_i32_0 = arith.constant 0 : i32
    %c0_i32_1 = arith.constant 0 : i32
    return %c0_i32, %c0_i32_0 : i32, i32
  }
  func.func @transform_2(%arg0: i32) -> (i32, i32) {
    %c0_i32 = arith.constant 0 : i32
    %c0_i32_0 = arith.constant 0 : i32
    return %arg0, %c0_i32 : i32, i32
  }
}

</mosaic_0001>

<bundles_post_ra>
// kernel: tpu_custom_call.1
= control target key start
LH: loop header
LB: loop body
LE: loop exit
PB: predicated region body
PF: predicated region fallthrough
CT: control target
= control target key end

     0   :  { %s928_s0 = inlined_call_operand.vmem [shape: f32[8,1], index: 0, kind: input, shape index: {}]   ;;  %s929_s1 = inlined_call_operand.vmem [shape: f32[1,256], index: 1, kind: input, shape index: {}]   ;;  %s930_s2 = inlined_call_operand.hbm [shape: f32[8,512], index: 2, kind: output, shape index: {}]  }
   0x1   :  { %v12_v0 = vld [vmem:[%s928_s0] sm:$0xff] }
   0x2   :  { %7 = vsyncpa [#allocation3], 0  ;;  %v712_v1 = vmov 0   ;;  %v13_v2 = vmul.f32 6.2831855, %v12_v0  ;;  %s719_s0 = smov [#allocation2]  }
   0x3   :  { %685 = vset.pattern.permute.xlu0 %v712_v1  ;;  %v14_v3 = vld [vmem:[%s929_s1] sm:$0x3]  ;;  %v713_v32 = vmov 683565275   ;;  %v714_v34 = vmov 2475754826  }
   0x4   :  { %17 = vperm.xlu0 %685, %v13_v2   ;;  %v21_v4 = vperm.slane %v14_v3, 0  ;;  %v22_v5 = vperm.slane %v14_v3, 1  ;;  %v715_v38 = vmov 2131351028   ;;  %v716_v41 = vmov 2102212464  }
   0x5   :  { %v717_v44 = vmov 920167782   ;;  %v718_v47 = vmov 1326507024   ;;  %s654_s1 = sshll.u32 %s719_s0, 4  ;;  %s656_s15 = sshll.u32 %s930_s2, 4  ;;  %s655_s1 = int_to_ptr.vmem [resolvable:$true] %s654_s1  ;;  %s657_s15 = int_to_ptr.hbm [resolvable:$true] %s656_s15 }
  0x76   :  { %v18_v6 = vpop.permute.xlu0 %17 }
  0x77   :  { %v742_v7 = vmul.f32 %v21_v4, %v18_v6  ;;  %v744_v8 = vmul.f32 %v22_v5, %v18_v6 }
  0x79   :  { %v27_v9 = vand.u32 2147483647, %v742_v7  ;;  %v30_v10 = vand.u32 2139095040, %v742_v7  ;;  %v182_v11 = vand.u32 2147483647, %v744_v8  ;;  %v185_v12 = vand.u32 2139095040, %v744_v8 }
  0x7b   :  { %v31_v13 = vshrl.u32 %v30_v10, 23  ;;  %v34_v14 = vand.u32 8388607, %v27_v9  ;;  %v186_v15 = vshrl.u32 %v185_v12, 23  ;;  %v189_v18 = vand.u32 8388607, %v182_v11 }
  0x7d   :  { %v665_v16 = vadd.s32 4294967169, %v31_v13  ;;  %v35_v17 = vor.u32 8388608, %v34_v14  ;;  %v668_v19 = vadd.s32 4294967169, %v186_v15  ;;  %v190_v23 = vor.u32 8388608, %v189_v18 }
  0x7f   :  { %v37_v20 = vadd.s32 1, %v665_v16  ;;  %v192_v21 = vadd.s32 1, %v668_v19  ;;  %v754_v22 = vshll.u32 %v35_v17, 8  ;;  %v761_v30 = vshll.u32 %v190_v23, 8 }
  0x81   :  { %vm38_vm0 = vcmp.gt.s32.totalorder %v37_v20, 0  ;;  %vm193_vm1 = vcmp.gt.s32.totalorder %v192_v21, 0  ;;  %v757_v28 = vand.u32 65535, %v754_v22  ;;  %v77_v36 = vshrl.u32 %v754_v22, 16 }
  0x82   :  { %v39_v24 = vsel %vm38_vm0, %v37_v20, 0  ;;  %v194_v26 = vsel %vm193_vm1, %v192_v21, 0 }
  0x83   :  { %v41_v25 = vand.u32 31, %v39_v24  ;;  %v759_v29 = vand.u32 31, %v194_v26  ;;  %v763_v31 = vshrl.u32 %v39_v24, 5  ;;  %v801_v16 = vshrl.u32 %v194_v26, 5 }
  0x85   :  { %v42_v27 = vsub.s32 32, %v41_v25  ;;  %v44_v33 = vshll.u32 %v713_v32, %v41_v25  ;;  %v47_v35 = vshll.u32 %v714_v34, %v41_v25  ;;  %v50_v40 = vshll.u32 %v715_v38, %v41_v25 }
  0x86   :  { %v53_v43 = vshll.u32 %v716_v41, %v41_v25  ;;  %v56_v46 = vshll.u32 %v717_v44, %v41_v25  ;;  %v773_v52 = vsub.s32 32, %v759_v29  ;;  %vm59_vm2 = vcmp.lt.s32.totalorder %v763_v31, 1 }
  0x87   :  { %v45_v37 = vshrl.u32 %v714_v34, %v42_v27  ;;  %v48_v39 = vshrl.u32 %v715_v38, %v42_v27  ;;  %v51_v42 = vshrl.u32 %v716_v41, %v42_v27  ;;  %v54_v45 = vshrl.u32 %v717_v44, %v42_v27 }
  0x88   :  { %v57_v48 = vshrl.u32 %v718_v47, %v42_v27  ;;  %vm60_vm3 = vcmp.lt.s32.totalorder %v763_v31, 2  ;;  %v43_v55 = vshrl.u32 %v713_v32, %v42_v27  ;;  %vm62_vm4 = vcmp.lt.s32.totalorder %v763_v31, 4 }
  0x89   :  { %v46_v49 = vor.u32 %v45_v37, %v44_v33  ;;  %v49_v50 = vor.u32 %v48_v39, %v47_v35  ;;  %v52_v51 = vor.u32 %v51_v42, %v50_v40  ;;  %v55_v53 = vor.u32 %v54_v45, %v53_v43 }
  0x8a   :  { %v58_v54 = vor.u32 %v57_v48, %v56_v46  ;;  %vm61_vm5 = vcmp.lt.s32.totalorder %v763_v31, 3  ;;  %v199_v60 = vshll.u32 %v713_v32, %v759_v29  ;;  %v200_v0 = vshrl.u32 %v714_v34, %v773_v52 }
  0x8b   :  { %v67_v56 = vsel %vm59_vm2, %v46_v49, %v49_v50  ;;  %v71_v57 = vsel %vm59_vm2, %v49_v50, %v52_v51  ;;  %v68_v58 = vsel %vm62_vm4, %v55_v53, 920167782  ;;  %v64_v61 = vsel %vm62_vm4, %v52_v51, 2102212464 }
  0x8c   :  { %v72_v59 = vsel %vm62_vm4, %v58_v54, 1326507024  ;;  %v69_v62 = vsel %vm61_vm5, %v52_v51, %v68_v58  ;;  %v202_v4 = vshll.u32 %v714_v34, %v759_v29  ;;  %v203_v5 = vshrl.u32 %v715_v38, %v773_v52 }
  0x8d   :  { %v73_v63 = vsel %vm61_vm5, %v55_v53, %v72_v59  ;;  %v70_v2 = vsel %vm60_vm3, %v67_v56, %v69_v62  ;;  %v63_v14 = vsel %vm59_vm2, %v43_v55, %v46_v49  ;;  %v65_v15 = vsel %vm61_vm5, %v49_v50, %v64_v61 }
  0x8e   :  { %v74_v3 = vsel %vm60_vm3, %v71_v57, %v73_v63  ;;  %v100_v12 = vand.u32 65535, %v70_v2  ;;  %v101_v13 = vshrl.u32 %v70_v2, 16  ;;  %v803_v17 = vor.u32 %v200_v0, %v199_v60 }
  0x8f   :  { %v78_v6 = vand.u32 65535, %v74_v3  ;;  %v79_v10 = vshrl.u32 %v74_v3, 16  ;;  %v806_v20 = vor.u32 %v203_v5, %v202_v4  ;;  %v206_v21 = vshrl.u32 %v716_v41, %v773_v52 }
  0x90   :  { %v103_v24 = vmul.u32 %v101_v13, %v757_v28  ;;  %v104_v25 = vmul.u32 %v100_v12, %v77_v36  ;;  %v205_v27 = vshll.u32 %v715_v38, %v759_v29  ;;  %v102_v34 = vmul.u32 %v100_v12, %v757_v28 }
  0x91   :  { %v81_v18 = vmul.u32 %v79_v10, %v757_v28  ;;  %v82_v19 = vmul.u32 %v78_v6, %v77_v36  ;;  %v80_v23 = vmul.u32 %v78_v6, %v757_v28  ;;  %v83_v33 = vmul.u32 %v79_v10, %v77_v36 }
  0x92   :  { %v105_v35 = vmul.u32 %v101_v13, %v77_v36  ;;  %v106_v42 = vshll.u32 %v103_v24, 16  ;;  %v108_v45 = vshll.u32 %v104_v25, 16  ;;  %v814_v46 = vor.u32 %v206_v21, %v205_v27 }
  0x93   :  { %v84_v26 = vshll.u32 %v81_v18, 16  ;;  %v85_v37 = vshrl.u32 %v81_v18, 16  ;;  %v86_v39 = vshll.u32 %v82_v19, 16  ;;  %v87_v40 = vshrl.u32 %v82_v19, 16 }
  0x94   :  { %vm110_vm7 = vc.u32 %v102_v34, %v106_v42  ;;  %v112_v49 = vadd.s32 %v106_v42, %v102_v34  ;;  %v209_v38 = vshrl.u32 %v717_v44, %v773_v52  ;;  %v208_v36 = vshll.u32 %v716_v41, %v759_v29 }
  0x95   :  { %vm88_vm6 = vc.u32 %v80_v23, %v84_v26  ;;  %v90_v43 = vadd.s32 %v84_v26, %v80_v23  ;;  %v111_v28 = vsel %vm110_vm7, 1, %v712_v1  ;;  %v211_v54 = vshll.u32 %v717_v44, %v759_v29 }
  0x96   :  { %v89_v48 = vsel %vm88_vm6, 1, %v712_v1  ;;  %v113_v53 = vadd.s32 %v111_v28, %v105_v35  ;;  %vm114_vm9 = vc.u32 %v112_v49, %v108_v45  ;;  %v210_v57 = vor.u32 %v209_v38, %v208_v36 }
  0x97   :  { %v91_v50 = vadd.s32 %v89_v48, %v83_v33  ;;  %vm92_vm8 = vc.u32 %v90_v43, %v86_v39  ;;  %v115_v56 = vsel %vm114_vm9, 1, %v712_v1  ;;  %v212_v58 = vshrl.u32 %v718_v47, %v773_v52 }
  0x98   :  { %v93_v51 = vsel %vm92_vm8, 1, %v712_v1  ;;  %v107_v59 = vshrl.u32 %v103_v24, 16  ;;  %v109_v60 = vshrl.u32 %v104_v25, 16  ;;  %v828_v61 = vadd.s32 %v112_v49, %v108_v45 }
  0x99   :  { %v95_v55 = vadd.s32 %v93_v51, %v91_v50  ;;  %v117_v62 = vadd.s32 %v115_v56, %v113_v53  ;;  %v213_v63 = vor.u32 %v212_v58, %v211_v54  ;;  %vm214_vm10 = vcmp.lt.s32.totalorder %v801_v16, 1 }
  0x9a   :  { %vm217_vm11 = vcmp.lt.s32.totalorder %v801_v16, 4  ;;  %vm216_vm12 = vcmp.lt.s32.totalorder %v801_v16, 3  ;;  %v222_v29 = vsel %vm214_vm10, %v803_v17, %v806_v20  ;;  %vm215_vm13 = vcmp.lt.s32.totalorder %v801_v16, 2 }
  0x9b   :  { %v96_v41 = vadd.s32 %v95_v55, %v85_v37  ;;  %v118_v0 = vadd.s32 %v117_v62, %v107_v59  ;;  %v223_v44 = vsel %vm217_vm11, %v210_v57, 920167782  ;;  %v226_v3 = vsel %vm214_vm10, %v806_v20, %v814_v46 }
  0x9c   :  { %v224_v2 = vsel %vm216_vm12, %v814_v46, %v223_v44  ;;  %v66_v4 = vsel %vm60_vm3, %v63_v14, %v65_v15  ;;  %v227_v10 = vsel %vm217_vm11, %v213_v63, 1326507024  ;;  %v231_v13 = vand.u32 65535, %v761_v30 }
  0x9d   :  { %v839_v47 = vadd.s32 %v96_v41, %v87_v40  ;;  %v119_v5 = vadd.s32 %v118_v0, %v109_v60  ;;  %v225_v6 = vsel %vm215_vm13, %v222_v29, %v224_v2  ;;  %v228_v12 = vsel %vm216_vm12, %v210_v57, %v227_v10 }
  0x9e   :  { %v255_v18 = vand.u32 65535, %v225_v6  ;;  %v229_v31 = vsel %vm215_vm13, %v226_v3, %v228_v12  ;;  %v232_v14 = vshrl.u32 %v761_v30, 16  ;;  %v256_v15 = vshrl.u32 %v225_v6, 16 }
  0x9f   :  { %vm122_vm14 = vc.u32 %v839_v47, %v828_v61  ;;  %v123_v19 = vadd.s32 1, %v119_v5  ;;  %v120_v21 = vmul.u32 %v754_v22, %v66_v4  ;;  %v233_v23 = vand.u32 65535, %v229_v31 }
  0xa0   :  { %v234_v24 = vshrl.u32 %v229_v31, 16  ;;  %v258_v27 = vmul.u32 %v256_v15, %v231_v13  ;;  %v259_v33 = vmul.u32 %v255_v18, %v232_v14  ;;  %v257_v37 = vmul.u32 %v255_v18, %v231_v13 }
  0xa1   :  { %v124_v25 = vsel %vm122_vm14, %v123_v19, %v119_v5  ;;  %v237_v35 = vmul.u32 %v233_v23, %v232_v14  ;;  %v260_v39 = vmul.u32 %v256_v15, %v232_v14  ;;  %v235_v43 = vmul.u32 %v233_v23, %v231_v13 }
  0xa2   :  { %v125_v26 = vadd.s32 %v124_v25, %v120_v21  ;;  %v236_v34 = vmul.u32 %v234_v24, %v231_v13  ;;  %v261_v40 = vshll.u32 %v258_v27, 16  ;;  %v238_v45 = vmul.u32 %v234_v24, %v232_v14 }
  0xa3   :  { %v241_v49 = vshll.u32 %v237_v35, 16  ;;  %v263_v38 = vshll.u32 %v259_v33, 16  ;;  %v219_v55 = vsel %vm217_vm11, %v814_v46, 2102212464  ;;  %v198_v57 = vshrl.u32 %v713_v32, %v773_v52 }
  0xa4   :  { %v126_v42 = vadd.s32 536870912, %v125_v26  ;;  %v239_v48 = vshll.u32 %v236_v34, 16  ;;  %vm265_vm15 = vc.u32 %v257_v37, %v261_v40  ;;  %v267_v50 = vadd.s32 %v261_v40, %v257_v37 }
  0xa5   :  { %v266_v36 = vsel %vm265_vm15, 1, %v712_v1  ;;  %v240_v62 = vshrl.u32 %v236_v34, 16  ;;  %v218_v0 = vsel %vm214_vm10, %v198_v57, %v803_v17  ;;  %v220_v46 = vsel %vm216_vm12, %v806_v20, %v219_v55 }
  0xa6   :  { %v864_v22 = vshrl.u32 %v126_v42, 30  ;;  %vm243_vm0 = vc.u32 %v235_v43, %v239_v48  ;;  %v245_v28 = vadd.s32 %v239_v48, %v235_v43  ;;  %v268_v53 = vadd.s32 %v266_v36, %v260_v39 }
  0xa7   :  { %v244_v51 = vsel %vm243_vm0, 1, %v712_v1  ;;  %vm269_vm1 = vc.u32 %v267_v50, %v263_v38  ;;  %v262_v29 = vshrl.u32 %v258_v27, 16  ;;  %v242_v32 = vshrl.u32 %v237_v35, 16 }
  0xa8   :  { %v128_v54 = vshll.u32 %v864_v22, 30  ;;  %v246_v56 = vadd.s32 %v244_v51, %v238_v45  ;;  %vm247_vm2 = vc.u32 %v245_v28, %v241_v49  ;;  %v270_v59 = vsel %vm269_vm1, 1, %v712_v1 }
  0xa9   :  { %v248_v58 = vsel %vm247_vm2, 1, %v712_v1  ;;  %v272_v63 = vadd.s32 %v270_v59, %v268_v53  ;;  %v264_v2 = vshrl.u32 %v259_v33, 16  ;;  %v221_v6 = vsel %vm215_vm13, %v218_v0, %v220_v46 }
  0xaa   :  { %v129_v60 = vsub.s32 %v125_v26, %v128_v54  ;;  %v250_v41 = vadd.s32 %v248_v58, %v246_v56  ;;  %v271_v10 = vadd.s32 %v267_v50, %v263_v38  ;;  %v275_v20 = vmul.u32 %v761_v30, %v221_v6 }
  0xab   :  { %v273_v3 = vadd.s32 %v272_v63, %v262_v29  ;;  %v121_v14 = vadd.s32 %v828_v61, %v839_v47  ;;  %vm29_vm7 = vcmp.lt.s32.totalorder %v742_v7, 0  ;;  %v151_v45 = vsub.s32 4, %v864_v22 }
  0xac   :  { %vm130_vm3 = vcmp.lt.s32.totalorder %v129_v60, 0  ;;  %v131_v44 = vsub.s32 0, %v129_v60  ;;  %v251_v52 = vadd.s32 %v250_v41, %v240_v62  ;;  %vm894_vm8 = vcmp.le.f32.partialorder %v27_v9, 0.7853982 }
  0xad   :  { %v274_v12 = vadd.s32 %v273_v3, %v264_v2  ;;  %v152_v36 = vsel %vm29_vm7, %v151_v45, %v864_v22  ;;  %vm184_vm10 = vcmp.lt.s32.totalorder %v744_v8, 0  ;;  %vm907_vm11 = vcmp.le.f32.partialorder %v182_v11, 0.7853982 }
  0xae   :  { %v132_v1 = vsel %vm130_vm3, %v131_v44, %v129_v60  ;;  %v252_v4 = vadd.s32 %v251_v52, %v242_v32  ;;  %vm170_vm2 = vweird.f32 %v742_v7 }
  0xaf   :  { %v133_v5 = vclz %v132_v1  ;;  %v278_v13 = vadd.s32 1, %v274_v12 }
  0xb0   :  { %vm277_vm4 = vc.u32 %v252_v4, %v271_v10  ;;  %v276_v55 = vadd.s32 %v271_v10, %v252_v4 }
  0xb1   :  { %v666_v17 = vadd.s32 4294967294, %v133_v5  ;;  %v279_v18 = vsel %vm277_vm4, %v278_v13, %v274_v12 }
  0xb2   :  { %v280_v31 = vadd.s32 %v279_v18, %v275_v20 }
  0xb3   :  { %vm667_vm5 = vcmp.lt.s32.totalorder %v666_v17, 0 }
  0xb4   :  { %v136_v19 = vsel %vm667_vm5, 0, %v666_v17  ;;  %v281_v23 = vadd.s32 536870912, %v280_v31 }
  0xb5   :  { %v137_v15 = vsub.s32 32, %v136_v19  ;;  %v141_v21 = vsub.s32 4294967266, %v136_v19  ;;  %v138_v24 = vshll.u32 %v129_v60, %v136_v19  ;;  %v154_v60 = vsel %vm894_vm8, 0, %v152_v36 }
  0xb6   :  { %v887_v27 = vshrl.u32 %v281_v23, 30  ;;  %v171_v32 = vadd.s32 3, %v154_v60  ;;  %v483_v5 = vand.u32 3, %v154_v60 }
  0xb7   :  { %v139_v16 = vshrl.u32 %v121_v14, %v137_v15  ;;  %v142_v25 = vadd.s32 127, %v141_v21 }
  0xb8   :  { %v283_v34 = vshll.u32 %v887_v27, 30  ;;  %v172_v12 = vand.u32 3, %v171_v32  ;;  %vm484_vm12 = vcmp.lt.s32.totalorder %v483_v5, 2  ;;  %vm485_vm13 = vcmp.eq.s32.totalorder %v483_v5, 0 }
  0xb9   :  { %v140_v33 = vor.u32 %v139_v16, %v138_v24  ;;  %v143_v26 = vshll.u32 %v142_v25, 23  ;;  %v306_v21 = vsub.s32 4, %v887_v27  ;;  %vm488_vm1 = vcmp.eq.s32.totalorder %v483_v5, 2 }
  0xba   :  { %v284_v35 = vsub.s32 %v280_v31, %v283_v34  ;;  %vm173_vm14 = vcmp.lt.s32.totalorder %v172_v12, 2  ;;  %vm174_vm15 = vcmp.eq.s32.totalorder %v172_v12, 0  ;;  %vm177_vm0 = vcmp.eq.s32.totalorder %v172_v12, 2 }
  0xbb   :  { %v144_v30 = vor.u32 4788187, %v143_v26  ;;  %v147_v39 = vcvt.s32.f32 %v140_v33 }
  0xbc   :  { %vm285_vm6 = vcmp.lt.s32.totalorder %v284_v35, 0  ;;  %v286_v40 = vsub.s32 0, %v284_v35 }
  0xbd   :  { %v145_v37 = vand.u32 2147483647, %v144_v30 }
  0xbe   :  { %v287_v61 = vsel %vm285_vm6, %v286_v40, %v284_v35 }
  0xbf   :  { %v148_v42 = vmul.f32 %v147_v39, %v145_v37  ;;  %v288_v43 = vclz %v287_v61  ;;  %v307_v39 = vsel %vm184_vm10, %v306_v21, %v887_v27 }
  0xc0   :  { %v309_v61 = vsel %vm907_vm11, 0, %v307_v39 }
  0xc1   :  { %v149_v47 = vxor.u32 2147483648, %v148_v42  ;;  %v669_v38 = vadd.s32 4294967294, %v288_v43  ;;  %v326_v48 = vadd.s32 3, %v309_v61  ;;  %v637_v36 = vand.u32 3, %v309_v61 }
  0xc3   :  { %v150_v49 = vsel %vm29_vm7, %v149_v47, %v148_v42  ;;  %vm670_vm9 = vcmp.lt.s32.totalorder %v669_v38, 0  ;;  %vm638_vm3 = vcmp.lt.s32.totalorder %v637_v36, 2  ;;  %vm639_vm4 = vcmp.eq.s32.totalorder %v637_v36, 0 }
  0xc4   :  { %v153_v50 = vsel %vm894_vm8, %v742_v7, %v150_v49  ;;  %v291_v51 = vsel %vm670_vm9, 0, %v669_v38  ;;  %vm642_vm8 = vcmp.eq.s32.totalorder %v637_v36, 2  ;;  %vm325_vm9 = vweird.f32 %v744_v8 }
  0xc5   :  { %v155_v28 = vmul.f32 %v153_v50, %v153_v50  ;;  %v292_v56 = vsub.s32 32, %v291_v51  ;;  %v296_v57 = vsub.s32 4294967266, %v291_v51  ;;  %v293_v62 = vshll.u32 %v284_v35, %v291_v51 }
  0xc6   :  { %v327_v51 = vand.u32 3, %v326_v48 }
  0xc7   :  { %v156_v53 = vmul.f32 -0.001358992, %v155_v28  ;;  %v163_v54 = vmul.f32 -0.00019511016, %v155_v28  ;;  %v294_v59 = vshrl.u32 %v276_v55, %v292_v56  ;;  %v297_v41 = vadd.s32 127, %v296_v57 }
  0xc8   :  { %vm328_vm5 = vcmp.lt.s32.totalorder %v327_v51, 2  ;;  %vm329_vm6 = vcmp.eq.s32.totalorder %v327_v51, 0  ;;  %vm332_vm7 = vcmp.eq.s32.totalorder %v327_v51, 2 }
  0xc9   :  { %v157_v9 = vadd.f32 0.041655596, %v156_v53  ;;  %v164_v58 = vadd.f32 0.008332121, %v163_v54  ;;  %v295_v46 = vor.u32 %v294_v59, %v293_v62  ;;  %v298_v29 = vshll.u32 %v297_v41, 23 }
  0xcb   :  { %v158_v63 = vmul.f32 %v157_v9, %v155_v28  ;;  %v165_v0 = vmul.f32 %v164_v58, %v155_v28  ;;  %v299_v52 = vor.u32 4788187, %v298_v29  ;;  %v302_v4 = vcvt.s32.f32 %v295_v46 }
  0xcd   :  { %v159_v44 = vadd.f32 -0.4999988, %v158_v63  ;;  %v166_v22 = vadd.f32 -0.16666654, %v165_v0  ;;  %v300_v1 = vand.u32 2147483647, %v299_v52 }
  0xcf   :  { %v160_v2 = vmul.f32 %v159_v44, %v155_v28  ;;  %v167_v3 = vmul.f32 %v166_v22, %v155_v28  ;;  %v303_v17 = vmul.f32 %v302_v4, %v300_v1 }
  0xd1   :  { %v161_v6 = vadd.f32 1.0, %v160_v2  ;;  %v168_v10 = vadd.f32 1.0, %v167_v3  ;;  %v304_v19 = vxor.u32 2147483648, %v303_v17 }
  0xd3   :  { %v169_v13 = vmul.f32 %v168_v10, %v153_v50  ;;  %v178_v20 = vxor.u32 2147483648, %v161_v6  ;;  %v305_v15 = vsel %vm184_vm10, %v304_v19, %v303_v17 }
  0xd4   :  { %v308_v11 = vsel %vm907_vm11, %v744_v8, %v305_v15 }
  0xd5   :  { %v175_v31 = vxor.u32 2147483648, %v169_v13  ;;  %v179_v14 = vsel %vm177_vm0, %v178_v20, %v169_v13  ;;  %v490_v16 = vsel %vm488_vm1, %v178_v20, %v169_v13  ;;  %v310_v33 = vmul.f32 %v308_v11, %v308_v11 }
  0xd7   :  { %v176_v23 = vsel %vm174_vm15, %v161_v6, %v175_v31  ;;  %v487_v24 = vsel %vm485_vm13, %v161_v6, %v175_v31  ;;  %v311_v35 = vmul.f32 -0.001358992, %v310_v33  ;;  %v318_v37 = vmul.f32 -0.00019511016, %v310_v33 }
  0xd8   :  { %v180_v25 = vsel %vm173_vm14, %v176_v23, %v179_v14  ;;  %v491_v26 = vsel %vm484_vm12, %v487_v24, %v490_v16 }
  0xd9   :  { %v181_v34 = vsel %vm170_vm2, nan, %v180_v25  ;;  %v492_v30 = vsel %vm170_vm2, nan, %v491_v26  ;;  %v312_v40 = vadd.f32 0.041655596, %v311_v35  ;;  %v319_v42 = vadd.f32 0.008332121, %v318_v37 }
  0xda   :  { %337 = vst [vmem:[#allocation2] sm:$0xff] %v181_v34 }
  0xdb   :  { %647 = vst [vmem:[#allocation2 + $0x10] sm:$0xff] %v492_v30  ;;  %v313_v7 = vmul.f32 %v312_v40, %v310_v33  ;;  %v320_v47 = vmul.f32 %v319_v42, %v310_v33 }
  0xdd   :  { %v314_v43 = vadd.f32 -0.4999988, %v313_v7  ;;  %v321_v45 = vadd.f32 -0.16666654, %v320_v47 }
  0xdf   :  { %v315_v49 = vmul.f32 %v314_v43, %v310_v33  ;;  %v322_v38 = vmul.f32 %v321_v45, %v310_v33 }
  0xe1   :  { %v316_v50 = vadd.f32 1.0, %v315_v49  ;;  %v323_v28 = vadd.f32 1.0, %v322_v38 }
  0xe3   :  { %v324_v53 = vmul.f32 %v323_v28, %v308_v11  ;;  %v333_v54 = vxor.u32 2147483648, %v316_v50 }
  0xe5   :  { %v330_v27 = vxor.u32 2147483648, %v324_v53  ;;  %v334_v56 = vsel %vm332_vm7, %v333_v54, %v324_v53  ;;  %v644_v9 = vsel %vm642_vm8, %v333_v54, %v324_v53 }
  0xe7   :  { %v331_v55 = vsel %vm329_vm6, %v316_v50, %v330_v27  ;;  %v641_v57 = vsel %vm639_vm4, %v316_v50, %v330_v27 }
  0xe8   :  { %v335_v58 = vsel %vm328_vm5, %v331_v55, %v334_v56  ;;  %v645_v59 = vsel %vm638_vm3, %v641_v57, %v644_v9 }
  0xe9   :  { %v336_v60 = vsel %vm325_vm9, nan, %v335_v58  ;;  %v646_v62 = vsel %vm325_vm9, nan, %v645_v59 }
  0xea   :  { %338 = vst [vmem:[#allocation2 + $0x8] sm:$0xff] %v336_v60 }
  0xeb   :  { %648 = vst [vmem:[#allocation2 + $0x18] sm:$0xff] %v646_v62 }
  0xec   :  { %659 = dma.vmem_to_hbm [thread:$0]  %s655_s1, 512, %s657_s15, [#allocation3]  }
  0xed   :  { %710 = dma.done.wait [#allocation3], 512  }
  0xee   :  { %711 = vsyncadd [#allocation3], 4294966784 }
  0xef   :  { %664 = vsyncpa [#allocation3], 1 }

</bundles_post_ra>
